<compile_context>
chip_gen: v6e
topology: v6e:2x2x1
jax: 0.10.0
libtpu: 0.0.40
codegen_flags: <defaults>
</compile_context>

<pallas_src>
import jax
import jax.numpy as jnp
from jax import lax
from jax.experimental import pallas as pl
from jax.experimental.pallas import tpu as pltpu


def _make_denoise_head_kernel(H, W, compute_dtype):
    """Builds the fused conv3x3 + conv3x3 kernel for a fixed spatial size."""
    S = H * W

    def kernel(x_ref, w1_ref, b1_ref, w2_ref, b2_ref, den_ref, feat_ref):
        # x_ref:    (1, Cin, S)   compute_dtype, spatial flattened onto lanes
        # w1_ref:   (Cf, 9*Cin)   compute_dtype
        # b1_ref:   (Cf, 1)       f32
        # w2_ref:   (Cout, 9*Cf)  compute_dtype
        # b2_ref:   (Cout, 1)     f32
        # den_ref:  (1, Cout, S)  out dtype (lane-dense store)
        # feat_ref: (1, Cf, S)    out dtype (lane-dense store)

        # Boundary-column masks (w == 0 / w == W-1), shared by both convs.
        pos = lax.broadcasted_iota(jnp.int32, (1, S), 1)
        pw = pos % W
        m_w0 = pw == 0          # left-neighbour tap is out of bounds here
        m_wl = pw == (W - 1)    # right-neighbour tap is out of bounds here

        def im2col_3x3(a):
            """(C, S) -> (9*C, S); tap rows ordered k = 3*dy + dx, then c."""
            C = a.shape[0]
            # Zero rows above/below handle the dy = -1/+1 halo; the dx halo is
            # handled by masking the wrapped boundary column per tap.
            zpad = jnp.zeros((C, W + 1), a.dtype)
            z = jnp.concatenate([zpad, a, zpad], axis=1)   # (C, S + 2W + 2)
            blocks = []
            for oy in (-1, 0, 1):
                for ox in (-1, 0, 1):
                    start = (W + 1) + oy * W + ox          # static, >= 0
                    blk = z[:, start:start + S]            # (C, S)
                    if ox == -1:
                        blk = jnp.where(m_w0, jnp.zeros_like(blk), blk)
                    elif ox == 1:
                        blk = jnp.where(m_wl, jnp.zeros_like(blk), blk)
                    blocks.append(blk)
            return jnp.concatenate(blocks, axis=0)         # (9*C, S)

        # conv1: single MXU matmul, K = 9*Cin, N = S (lane-dense), f32 acc.
        p1 = im2col_3x3(x_ref[0])
        feat = jnp.dot(w1_ref[...], p1,
                       preferred_element_type=jnp.float32)  # (Cf, S)
        feat = feat + b1_ref[...]                            # bias epilogue
        feat_ref[0] = feat.astype(feat_ref.dtype)

        # conv2 consumes the features directly (no HBM round trip, no second
        # kernel launch, no jnp.pad of the intermediate).
        p2 = im2col_3x3(feat.astype(compute_dtype))
        den = jnp.dot(w2_ref[...], p2,
                      preferred_element_type=jnp.float32)    # (Cout, S)
        den = den + b2_ref[...]
        den_ref[0] = den.astype(den_ref.dtype)

    return kernel


def denoise_head_forward(x_nchw, params, *, compute_dtype=jnp.bfloat16):
    """Pallas implementation of DenoiseHead.forward.

    x_nchw: (N, num_feat, H, W) (PyTorch NCHW convention).
    Returns (denoise, features), both NCHW, in x_nchw.dtype.
    """
    N, Cin, H, W = x_nchw.shape
    w1, b1, w2, b2 = params["w1"], params["b1"], params["w2"], params["b2"]
    Cf = w1.shape[-1]
    Cout = w2.shape[-1]
    S = H * W

    # Free reshapes / tiny weight reshuffles only (no activation pad/transpose):
    # activations are (N, C, H*W) with the spatial axis on lanes.
    x_flat = x_nchw.reshape(N, Cin, S).astype(compute_dtype)
    w1_mat = jnp.transpose(w1.reshape(9 * Cin, Cf)).astype(compute_dtype)
    w2_mat = jnp.transpose(w2.reshape(9 * Cf, Cout)).astype(compute_dtype)
    b1_col = b1.reshape(Cf, 1).astype(jnp.float32)
    b2_col = b2.reshape(Cout, 1).astype(jnp.float32)

    kernel = _make_denoise_head_kernel(H, W, compute_dtype)

    # NOTE: weights/biases have constant index_maps; their double-buffer cost is
    # negligible here (<40 KiB).  For production H*W, tile the spatial axis
    # (grid=(N, S//tS), both "parallel") with a 2-row halo so the per-step VMEM
    # block fits v7x's 64 MiB and the DMA pipeline has >2 steps to overlap.
    den_flat, feat_flat = pl.pallas_call(
        kernel,
        out_shape=(
            jax.ShapeDtypeStruct((N, Cout, S), x_nchw.dtype),
            jax.ShapeDtypeStruct((N, Cf, S), x_nchw.dtype),
        ),
        grid_spec=pltpu.PrefetchScalarGridSpec(
            num_scalar_prefetch=0,
            grid=(N,),
            in_specs=[
                pl.BlockSpec((1, Cin, S), lambda n: (n, 0, 0)),
                pl.BlockSpec((Cf, 9 * Cin), lambda n: (0, 0)),
                pl.BlockSpec((Cf, 1), lambda n: (0, 0)),
                pl.BlockSpec((Cout, 9 * Cf), lambda n: (0, 0)),
                pl.BlockSpec((Cout, 1), lambda n: (0, 0)),
            ],
            out_specs=[
                pl.BlockSpec((1, Cout, S), lambda n: (n, 0, 0)),
                pl.BlockSpec((1, Cf, S), lambda n: (n, 0, 0)),
            ],
        ),
        compiler_params=pltpu.CompilerParams(
            dimension_semantics=("parallel",)),
    )(x_flat, w1_mat, b1_col, w2_mat, b2_col)

    denoise = den_flat.reshape(N, Cout, H, W)
    features = feat_flat.reshape(N, Cf, H, W)
    return denoise, features


def init_params(key, num_feat, out_channels):
    k1, k2, k3, k4 = jax.random.split(key, 4)
    # Deterministic synthetic init (scaled like kaiming-uniform fan-in=9*Cin).
    s1 = 1.0 / jnp.sqrt(9.0 * num_feat)
    return {
        "w1": jax.random.uniform(k1, (3, 3, num_feat, num_feat),
                                 jnp.float32, -s1, s1),
        "b1": jax.random.uniform(k2, (num_feat,), jnp.float32, -s1, s1),
        "w2": jax.random.uniform(k3, (3, 3, num_feat, out_channels),
                                 jnp.float32, -s1, s1),
        "b2": jax.random.uniform(k4, (out_channels,), jnp.float32, -s1, s1),
    }


def _reference_forward(x_nchw, params, cast_dtype=None):
    """Pure-JAX reference (lax conv, NCHW).

    cast_dtype=None     -> exact f32 module semantics.
    cast_dtype=bfloat16 -> mirrors the kernel's bf16-input / f32-accumulate
                           numerics so the comparison is tight.
    """
    def conv(x, w, b):
        if cast_dtype is not None:
            x = x.astype(cast_dtype).astype(jnp.float32)
            w = w.astype(cast_dtype).astype(jnp.float32)
        w_oihw = jnp.transpose(w, (3, 2, 0, 1))
        y = lax.conv_general_dilated(
            x, w_oihw, window_strides=(1, 1), padding="SAME",
            dimension_numbers=("NCHW", "OIHW", "NCHW"),
            precision=lax.Precision.HIGHEST)
        return y + b[None, :, None, None]

    feats = conv(x_nchw, params["w1"], params["b1"])
    den = conv(feats, params["w2"], params["b2"])
    return den, feats


if __name__ == "__main__":
    N, num_feat, out_channels, H, W = 2, 32, 4, 16, 16

    key = jax.random.PRNGKey(0)
    kx, kp = jax.random.split(key)
    x = jax.random.normal(kx, (N, num_feat, H, W), jnp.float32)
    params = init_params(kp, num_feat, out_channels)

    denoise, features = jax.jit(denoise_head_forward)(x, params)
    denoise = jax.block_until_ready(denoise)
    features = jax.block_until_ready(features)

    assert denoise.shape == (N, out_channels, H, W)
    assert features.shape == (N, num_feat, H, W)

    # Tight check against a reference with matching bf16-input numerics.
    den_bf, feat_bf = _reference_forward(x, params, cast_dtype=jnp.bfloat16)
    assert jnp.allclose(features, feat_bf, atol=2e-3, rtol=2e-3)
    assert jnp.allclose(denoise, den_bf, atol=2e-3, rtol=2e-3)

    # Sanity check against the pure-f32 module semantics (bf16-level error).
    den_f32, feat_f32 = _reference_forward(x, params)
    assert jnp.allclose(features, feat_f32, atol=2e-2, rtol=2e-2)
    assert jnp.allclose(denoise, den_f32, atol=2e-2, rtol=2e-2)

    print("KERNEL_OK")
</pallas_src>

<mosaic_0001>
module attributes {stable_mosaic.version = 11 : i64} {
  func.func @kernel(%arg0: i32, %arg1: memref<1x32x256xbf16, #tpu.memory_space<vmem>>, %arg2: memref<32x288xbf16, #tpu.memory_space<vmem>>, %arg3: memref<32x1xf32, #tpu.memory_space<vmem>>, %arg4: memref<4x288xbf16, #tpu.memory_space<vmem>>, %arg5: memref<4x1xf32, #tpu.memory_space<vmem>>, %arg6: memref<1x4x256xf32, #tpu.memory_space<vmem>>, %arg7: memref<1x32x256xf32, #tpu.memory_space<vmem>>) attributes {dimension_semantics = [#tpu.dimension_semantics<parallel>], iteration_bounds = array<i64: 2>, scalar_prefetch = 0 : i64, scratch_operands = 0 : i64, tpu.core_type = #tpu.core_type<tc>, window_params = [{transform_indices = @transform_0, window_bounds = array<i64: 1, 32, 256>}, {pipeline_mode = #tpu.pipeline_mode<synchronous>, transform_indices = @transform_1, window_bounds = array<i64: 32, 288>}, {pipeline_mode = #tpu.pipeline_mode<synchronous>, transform_indices = @transform_2, window_bounds = array<i64: 32, 1>}, {pipeline_mode = #tpu.pipeline_mode<synchronous>, transform_indices = @transform_3, window_bounds = array<i64: 4, 288>}, {pipeline_mode = #tpu.pipeline_mode<synchronous>, transform_indices = @transform_4, window_bounds = array<i64: 4, 1>}, {transform_indices = @transform_5, window_bounds = array<i64: 1, 4, 256>}, {transform_indices = @transform_6, window_bounds = array<i64: 1, 32, 256>}]} {
    %0 = tpu.iota {dimensions = array<i32: 1>} : vector<1x256xi32>
    %c16_i32 = arith.constant 16 : i32
    %c0_i32 = arith.constant 0 : i32
    %1 = arith.cmpi eq, %c16_i32, %c0_i32 : i32
    %c1_i32 = arith.constant 1 : i32
    %2 = arith.select %1, %c1_i32, %c16_i32 : i32
    %3 = vector.broadcast %2 : i32 to vector<1x256xi32>
    %4 = arith.remsi %0, %3 : vector<1x256xi32>
    %c0_i32_0 = arith.constant 0 : i32
    %5 = vector.broadcast %c0_i32_0 : i32 to vector<1x256xi32>
    %6 = arith.cmpi ne, %4, %5 : vector<1x256xi32>
    %c0_i32_1 = arith.constant 0 : i32
    %7 = vector.broadcast %c0_i32_1 : i32 to vector<1x256xi32>
    %8 = arith.cmpi slt, %4, %7 : vector<1x256xi32>
    %c0_i32_2 = arith.constant 0 : i32
    %9 = arith.cmpi slt, %2, %c0_i32_2 : i32
    %10 = vector.broadcast %9 : i1 to vector<1x256xi1>
    %11 = vector.broadcast %10 : vector<1x256xi1> to vector<1x256xi1>
    %12 = arith.xori %8, %11 : vector<1x256xi1>
    %13 = arith.andi %12, %6 : vector<1x256xi1>
    %14 = vector.broadcast %2 : i32 to vector<1x256xi32>
    %15 = arith.addi %4, %14 : vector<1x256xi32>
    %16 = arith.select %13, %15, %4 : vector<1x256xi1>, vector<1x256xi32>
    %c0_i32_3 = arith.constant 0 : i32
    %17 = vector.broadcast %c0_i32_3 : i32 to vector<1x256xi32>
    %18 = arith.cmpi eq, %16, %17 : vector<1x256xi32>
    %c15_i32 = arith.constant 15 : i32
    %19 = vector.broadcast %c15_i32 : i32 to vector<1x256xi32>
    %20 = arith.cmpi eq, %16, %19 : vector<1x256xi32>
    %c0 = arith.constant 0 : index
    %c0_4 = arith.constant 0 : index
    %c0_5 = arith.constant 0 : index
    %21 = vector.load %arg1[%c0, %c0_4, %c0_5] : memref<1x32x256xbf16, #tpu.memory_space<vmem>>, vector<1x32x256xbf16>
    %22 = vector.shape_cast %21 : vector<1x32x256xbf16> to vector<32x256xbf16>
    %cst = arith.constant 0.000000e+00 : bf16
    %23 = vector.broadcast %cst : bf16 to vector<32x17xbf16>
    %24 = tpu.concatenate %23, %22, %23 in 1 : vector<32x17xbf16>, vector<32x256xbf16>, vector<32x17xbf16> -> vector<32x290xbf16>
    %25 = vector.extract_strided_slice %24 {offsets = [0, 0], sizes = [32, 256], strides = [1, 1]} : vector<32x290xbf16> to vector<32x256xbf16>
    %cst_6 = arith.constant 0.000000e+00 : bf16
    %26 = vector.broadcast %cst_6 : bf16 to vector<32x256xbf16>
    %27 = vector.shape_cast %18 : vector<1x256xi1> to vector<1x256xi1>
    %28 = vector.broadcast %27 : vector<1x256xi1> to vector<32x256xi1>
    %29 = arith.select %28, %26, %25 : vector<32x256xi1>, vector<32x256xbf16>
    %30 = vector.extract_strided_slice %24 {offsets = [0, 1], sizes = [32, 256], strides = [1, 1]} : vector<32x290xbf16> to vector<32x256xbf16>
    %31 = vector.extract_strided_slice %24 {offsets = [0, 2], sizes = [32, 256], strides = [1, 1]} : vector<32x290xbf16> to vector<32x256xbf16>
    %cst_7 = arith.constant 0.000000e+00 : bf16
    %32 = vector.broadcast %cst_7 : bf16 to vector<32x256xbf16>
    %33 = vector.shape_cast %20 : vector<1x256xi1> to vector<1x256xi1>
    %34 = vector.broadcast %33 : vector<1x256xi1> to vector<32x256xi1>
    %35 = arith.select %34, %32, %31 : vector<32x256xi1>, vector<32x256xbf16>
    %36 = vector.extract_strided_slice %24 {offsets = [0, 16], sizes = [32, 256], strides = [1, 1]} : vector<32x290xbf16> to vector<32x256xbf16>
    %cst_8 = arith.constant 0.000000e+00 : bf16
    %37 = vector.broadcast %cst_8 : bf16 to vector<32x256xbf16>
    %38 = vector.shape_cast %18 : vector<1x256xi1> to vector<1x256xi1>
    %39 = vector.broadcast %38 : vector<1x256xi1> to vector<32x256xi1>
    %40 = arith.select %39, %37, %36 : vector<32x256xi1>, vector<32x256xbf16>
    %41 = vector.extract_strided_slice %24 {offsets = [0, 17], sizes = [32, 256], strides = [1, 1]} : vector<32x290xbf16> to vector<32x256xbf16>
    %42 = vector.extract_strided_slice %24 {offsets = [0, 18], sizes = [32, 256], strides = [1, 1]} : vector<32x290xbf16> to vector<32x256xbf16>
    %cst_9 = arith.constant 0.000000e+00 : bf16
    %43 = vector.broadcast %cst_9 : bf16 to vector<32x256xbf16>
    %44 = vector.shape_cast %20 : vector<1x256xi1> to vector<1x256xi1>
    %45 = vector.broadcast %44 : vector<1x256xi1> to vector<32x256xi1>
    %46 = arith.select %45, %43, %42 : vector<32x256xi1>, vector<32x256xbf16>
    %47 = vector.extract_strided_slice %24 {offsets = [0, 32], sizes = [32, 256], strides = [1, 1]} : vector<32x290xbf16> to vector<32x256xbf16>
    %cst_10 = arith.constant 0.000000e+00 : bf16
    %48 = vector.broadcast %cst_10 : bf16 to vector<32x256xbf16>
    %49 = vector.shape_cast %18 : vector<1x256xi1> to vector<1x256xi1>
    %50 = vector.broadcast %49 : vector<1x256xi1> to vector<32x256xi1>
    %51 = arith.select %50, %48, %47 : vector<32x256xi1>, vector<32x256xbf16>
    %52 = vector.extract_strided_slice %24 {offsets = [0, 33], sizes = [32, 256], strides = [1, 1]} : vector<32x290xbf16> to vector<32x256xbf16>
    %53 = vector.extract_strided_slice %24 {offsets = [0, 34], sizes = [32, 256], strides = [1, 1]} : vector<32x290xbf16> to vector<32x256xbf16>
    %cst_11 = arith.constant 0.000000e+00 : bf16
    %54 = vector.broadcast %cst_11 : bf16 to vector<32x256xbf16>
    %55 = vector.shape_cast %20 : vector<1x256xi1> to vector<1x256xi1>
    %56 = vector.broadcast %55 : vector<1x256xi1> to vector<32x256xi1>
    %57 = arith.select %56, %54, %53 : vector<32x256xi1>, vector<32x256xbf16>
    %58 = tpu.concatenate %29, %30, %35, %40, %41, %46, %51, %52, %57 in 0 : vector<32x256xbf16>, vector<32x256xbf16>, vector<32x256xbf16>, vector<32x256xbf16>, vector<32x256xbf16>, vector<32x256xbf16>, vector<32x256xbf16>, vector<32x256xbf16>, vector<32x256xbf16> -> vector<288x256xbf16>
    %c0_12 = arith.constant 0 : index
    %c0_13 = arith.constant 0 : index
    %59 = vector.load %arg2[%c0_12, %c0_13] : memref<32x288xbf16, #tpu.memory_space<vmem>>, vector<32x288xbf16>
    %cst_14 = arith.constant dense<0.000000e+00> : vector<32x256xf32>
    %60 = tpu.matmul %59, %58, %cst_14 {dimension_numbers = #tpu.dot_dimension_numbers<[1], [0], [0], [1], [0, 0, 1, 1], [], []>} : vector<32x288xbf16>, vector<288x256xbf16>, vector<32x256xf32> -> vector<32x256xf32>
    %c0_15 = arith.constant 0 : index
    %c0_16 = arith.constant 0 : index
    %61 = vector.load %arg3[%c0_15, %c0_16] : memref<32x1xf32, #tpu.memory_space<vmem>>, vector<32x1xf32>
    %62 = vector.broadcast %61 : vector<32x1xf32> to vector<32x256xf32>
    %63 = arith.addf %60, %62 : vector<32x256xf32>
    %c0_17 = arith.constant 0 : index
    %c0_18 = arith.constant 0 : index
    %c0_19 = arith.constant 0 : index
    %64 = vector.load %arg7[%c0_17, %c0_18, %c0_19] : memref<1x32x256xf32, #tpu.memory_space<vmem>>, vector<1x32x256xf32>
    %65 = vector.shape_cast %64 : vector<1x32x256xf32> to vector<32x256xf32>
    %66 = vector.shape_cast %63 : vector<32x256xf32> to vector<1x32x256xf32>
    tpu.vector_store %arg7[%c0_17, %c0_18, %c0_19], %66 {strides = array<i32>} : memref<1x32x256xf32, #tpu.memory_space<vmem>>, vector<1x32x256xf32>,
    %67 = arith.truncf %63 : vector<32x256xf32> to vector<32x256xbf16>
    %cst_20 = arith.constant 0.000000e+00 : bf16
    %68 = vector.broadcast %cst_20 : bf16 to vector<32x17xbf16>
    %69 = tpu.concatenate %68, %67, %68 in 1 : vector<32x17xbf16>, vector<32x256xbf16>, vector<32x17xbf16> -> vector<32x290xbf16>
    %70 = vector.extract_strided_slice %69 {offsets = [0, 0], sizes = [32, 256], strides = [1, 1]} : vector<32x290xbf16> to vector<32x256xbf16>
    %cst_21 = arith.constant 0.000000e+00 : bf16
    %71 = vector.broadcast %cst_21 : bf16 to vector<32x256xbf16>
    %72 = vector.shape_cast %18 : vector<1x256xi1> to vector<1x256xi1>
    %73 = vector.broadcast %72 : vector<1x256xi1> to vector<32x256xi1>
    %74 = arith.select %73, %71, %70 : vector<32x256xi1>, vector<32x256xbf16>
    %75 = vector.extract_strided_slice %69 {offsets = [0, 1], sizes = [32, 256], strides = [1, 1]} : vector<32x290xbf16> to vector<32x256xbf16>
    %76 = vector.extract_strided_slice %69 {offsets = [0, 2], sizes = [32, 256], strides = [1, 1]} : vector<32x290xbf16> to vector<32x256xbf16>
    %cst_22 = arith.constant 0.000000e+00 : bf16
    %77 = vector.broadcast %cst_22 : bf16 to vector<32x256xbf16>
    %78 = vector.shape_cast %20 : vector<1x256xi1> to vector<1x256xi1>
    %79 = vector.broadcast %78 : vector<1x256xi1> to vector<32x256xi1>
    %80 = arith.select %79, %77, %76 : vector<32x256xi1>, vector<32x256xbf16>
    %81 = vector.extract_strided_slice %69 {offsets = [0, 16], sizes = [32, 256], strides = [1, 1]} : vector<32x290xbf16> to vector<32x256xbf16>
    %cst_23 = arith.constant 0.000000e+00 : bf16
    %82 = vector.broadcast %cst_23 : bf16 to vector<32x256xbf16>
    %83 = vector.shape_cast %18 : vector<1x256xi1> to vector<1x256xi1>
    %84 = vector.broadcast %83 : vector<1x256xi1> to vector<32x256xi1>
    %85 = arith.select %84, %82, %81 : vector<32x256xi1>, vector<32x256xbf16>
    %86 = vector.extract_strided_slice %69 {offsets = [0, 17], sizes = [32, 256], strides = [1, 1]} : vector<32x290xbf16> to vector<32x256xbf16>
    %87 = vector.extract_strided_slice %69 {offsets = [0, 18], sizes = [32, 256], strides = [1, 1]} : vector<32x290xbf16> to vector<32x256xbf16>
    %cst_24 = arith.constant 0.000000e+00 : bf16
    %88 = vector.broadcast %cst_24 : bf16 to vector<32x256xbf16>
    %89 = vector.shape_cast %20 : vector<1x256xi1> to vector<1x256xi1>
    %90 = vector.broadcast %89 : vector<1x256xi1> to vector<32x256xi1>
    %91 = arith.select %90, %88, %87 : vector<32x256xi1>, vector<32x256xbf16>
    %92 = vector.extract_strided_slice %69 {offsets = [0, 32], sizes = [32, 256], strides = [1, 1]} : vector<32x290xbf16> to vector<32x256xbf16>
    %cst_25 = arith.constant 0.000000e+00 : bf16
    %93 = vector.broadcast %cst_25 : bf16 to vector<32x256xbf16>
    %94 = vector.shape_cast %18 : vector<1x256xi1> to vector<1x256xi1>
    %95 = vector.broadcast %94 : vector<1x256xi1> to vector<32x256xi1>
    %96 = arith.select %95, %93, %92 : vector<32x256xi1>, vector<32x256xbf16>
    %97 = vector.extract_strided_slice %69 {offsets = [0, 33], sizes = [32, 256], strides = [1, 1]} : vector<32x290xbf16> to vector<32x256xbf16>
    %98 = vector.extract_strided_slice %69 {offsets = [0, 34], sizes = [32, 256], strides = [1, 1]} : vector<32x290xbf16> to vector<32x256xbf16>
    %cst_26 = arith.constant 0.000000e+00 : bf16
    %99 = vector.broadcast %cst_26 : bf16 to vector<32x256xbf16>
    %100 = vector.shape_cast %20 : vector<1x256xi1> to vector<1x256xi1>
    %101 = vector.broadcast %100 : vector<1x256xi1> to vector<32x256xi1>
    %102 = arith.select %101, %99, %98 : vector<32x256xi1>, vector<32x256xbf16>
    %103 = tpu.concatenate %74, %75, %80, %85, %86, %91, %96, %97, %102 in 0 : vector<32x256xbf16>, vector<32x256xbf16>, vector<32x256xbf16>, vector<32x256xbf16>, vector<32x256xbf16>, vector<32x256xbf16>, vector<32x256xbf16>, vector<32x256xbf16>, vector<32x256xbf16> -> vector<288x256xbf16>
    %c0_27 = arith.constant 0 : index
    %c0_28 = arith.constant 0 : index
    %104 = vector.load %arg4[%c0_27, %c0_28] : memref<4x288xbf16, #tpu.memory_space<vmem>>, vector<4x288xbf16>
    %cst_29 = arith.constant dense<0.000000e+00> : vector<4x256xf32>
    %105 = tpu.matmul %104, %103, %cst_29 {dimension_numbers = #tpu.dot_dimension_numbers<[1], [0], [0], [1], [0, 0, 1, 1], [], []>} : vector<4x288xbf16>, vector<288x256xbf16>, vector<4x256xf32> -> vector<4x256xf32>
    %c0_30 = arith.constant 0 : index
    %c0_31 = arith.constant 0 : index
    %106 = vector.load %arg5[%c0_30, %c0_31] : memref<4x1xf32, #tpu.memory_space<vmem>>, vector<4x1xf32>
    %107 = vector.broadcast %106 : vector<4x1xf32> to vector<4x256xf32>
    %108 = arith.addf %105, %107 : vector<4x256xf32>
    %c0_32 = arith.constant 0 : index
    %c0_33 = arith.constant 0 : index
    %c0_34 = arith.constant 0 : index
    %109 = vector.load %arg6[%c0_32, %c0_33, %c0_34] : memref<1x4x256xf32, #tpu.memory_space<vmem>>, vector<1x4x256xf32>
    %110 = vector.shape_cast %109 : vector<1x4x256xf32> to vector<4x256xf32>
    %111 = vector.shape_cast %108 : vector<4x256xf32> to vector<1x4x256xf32>
    tpu.vector_store %arg6[%c0_32, %c0_33, %c0_34], %111 {strides = array<i32>} : memref<1x4x256xf32, #tpu.memory_space<vmem>>, vector<1x4x256xf32>,
    return
  }
  func.func @transform_0(%arg0: i32) -> (i32, i32, i32) {
    %c0_i32 = arith.constant 0 : i32
    %c0_i32_0 = arith.constant 0 : i32
    %c0_i32_1 = arith.constant 0 : i32
    return %arg0, %c0_i32, %c0_i32_0 : i32, i32, i32
  }
  func.func @transform_1(%arg0: i32) -> (i32, i32) {
    %c0_i32 = arith.constant 0 : i32
    %c0_i32_0 = arith.constant 0 : i32
    %c0_i32_1 = arith.constant 0 : i32
    return %c0_i32, %c0_i32_0 : i32, i32
  }
  func.func @transform_2(%arg0: i32) -> (i32, i32) {
    %c0_i32 = arith.constant 0 : i32
    %c0_i32_0 = arith.constant 0 : i32
    %c0_i32_1 = arith.constant 0 : i32
    return %c0_i32, %c0_i32_0 : i32, i32
  }
  func.func @transform_3(%arg0: i32) -> (i32, i32) {
    %c0_i32 = arith.constant 0 : i32
    %c0_i32_0 = arith.constant 0 : i32
    %c0_i32_1 = arith.constant 0 : i32
    return %c0_i32, %c0_i32_0 : i32, i32
  }
  func.func @transform_4(%arg0: i32) -> (i32, i32) {
    %c0_i32 = arith.constant 0 : i32
    %c0_i32_0 = arith.constant 0 : i32
    %c0_i32_1 = arith.constant 0 : i32
    return %c0_i32, %c0_i32_0 : i32, i32
  }
  func.func @transform_5(%arg0: i32) -> (i32, i32, i32) {
    %c0_i32 = arith.constant 0 : i32
    %c0_i32_0 = arith.constant 0 : i32
    %c0_i32_1 = arith.constant 0 : i32
    return %arg0, %c0_i32, %c0_i32_0 : i32, i32, i32
  }
  func.func @transform_6(%arg0: i32) -> (i32, i32, i32) {
    %c0_i32 = arith.constant 0 : i32
    %c0_i32_0 = arith.constant 0 : i32
    %c0_i32_1 = arith.constant 0 : i32
    return %arg0, %c0_i32, %c0_i32_0 : i32, i32, i32
  }
}

</mosaic_0001>

<bundles_post_ra>
// kernel: denoise_head_forward.1
= control target key start
LH: loop header
LB: loop body
LE: loop exit
PB: predicated region body
PF: predicated region fallthrough
CT: control target
= control target key end

     0   :  { %s1451_s21 = smov 0   ;;  %s2061_s0 = inlined_call_operand.vmem [shape: bf16[2,32,256], index: 0, kind: input, shape index: {}]   ;;  %s2062_s1 = inlined_call_operand.vmem [shape: bf16[32,288], index: 1, kind: input, shape index: {}]   ;;  %s2063_s2 = inlined_call_operand.vmem [shape: f32[32,1], index: 2, kind: input, shape index: {}]   ;;  %s2064_s3 = inlined_call_operand.vmem [shape: bf16[4,288], index: 3, kind: input, shape index: {}]   ;;  %s2065_s4 = inlined_call_operand.vmem [shape: f32[4,1], index: 4, kind: input, shape index: {}]   ;;  %s2066_s5 = inlined_call_operand.vmem [shape: f32[2,4,256], index: 5, kind: output, shape index: {0}]   ;;  %s2067_s6 = inlined_call_operand.vmem [shape: f32[2,32,256], index: 6, kind: output, shape index: {1}]  }
   0x1 LB: > { %s1304_s22 = sadd.s32 4294967295, %s1398_s21   ;;  %p1308_p0 = scmp.ge.s32.totalorder %s1398_s21, 1  ;;  %s1398_s21 = sphi %s1451_s21, %s17_s21  }
   0x2   : > { %p215_p1 = scmp.lt.s32.totalorder %s1398_s21, 3 }
   0x4   : > { %p216_p2 = pnand %p1308_p0, %p215_p1 }
   0x5   : > { %p250_p3 = scmp.lt.s32.totalorder (!%p216_p2), %s1304_s22, 1  ;;  %s1401_s27 = smov (!%p216_p2), 17  }
   0x6   : > { %219 = sbr.rel (%p216_p2) target bundleno = 1098 (0x44a), region = 40  ;;  %s1402_s28 = smov (!%p216_p2), 16  }
   0x7   : > { %s1403_s29 = smov (!%p216_p2), 2   ;;  %s1404_s30 = smov (!%p216_p2), 32  }
   0x8   : > { %s1405_s7 = smov (!%p216_p2), 18   ;;  %s1406_s8 = smov (!%p216_p2), 34  }
   0x9   : > { %s1407_s9 = smov (!%p216_p2), 127   ;;  %s1408_s10 = smov (!%p216_p2), 112  }
   0xa   : > { %s1409_s11 = smov (!%p216_p2), 126   ;;  %s1410_s12 = smov (!%p216_p2), 95  }
   0xb   : > { %v268_v0 = vlaneseq  ;;  %v1400_v1 = vmov 0   ;;  %s2112_s22 = smov (!%p250_p3, %s1304_s22), 1  ;;  %vm327_vm6 = vcmask 138240   ;;  %vm399_vm10 = vcmask 130048   ;;  %s1411_s13 = smov 96  }
   0xc   : > { %811 = vmatprep.mubr.bf16.mxu1 %v1400_v1  ;;  %1376 = vset.pattern.permute.xlu1 %v1400_v1  ;;  %s1346_s23 = sshll.u32 %s2112_s22, 5  ;;  %vm384_vm13 = vcmask 15360   ;;  %s1412_s14 = smov 110  }
   0xd   : > { %v269_v2 = vand.u32 127, %v268_v0  ;;  %1375 = vset.pattern.permute.xlu0 %v1400_v1  ;;  %v1464_v3 = vshrl.u32 %v268_v0, 7  ;;  %s254_s26 = scalar_lea.vmem %s2061_s0, %s1346_s23  ;;  %s1413_s15 = smov 111  }
   0xe   : > { %v1377_v6 = vld [vmem:[%s254_s26 + $0x10] ss:$8 sps:$4 sm:$0xff]   ;;  %v1379_v10 = vld [vmem:[%s254_s26 + $0x14] ss:$8 sps:$4 sm:$0xff]   ;;  %v1380_v14 = vld [vmem:[%s254_s26 + $0x4] ss:$8 sps:$4 sm:$0xff]  }
   0xf   : > { %v270_v4 = vadd.s32 128, %v269_v2  ;;  %v275_v5 = vand.u32 15, %v269_v2  ;;  %v354_v8 = vsub.s32 0, %v1464_v3  ;;  %323 = vrot.lane.b32.xlu1 %v1377_v6, %s1401_s27  ;;  %v358_v11 = vsub.s32 4, %v1464_v3  ;;  %v1382_v18 = vld [vmem:[%s254_s26] ss:$8 sps:$4 sm:$0xff]  }
  0x10   : > { %s1414_s16 = smov 94   ;;  %s1348_s26 = sshll.u32 %s2112_s22, 6 }
  0x11   : > { %v282_v7 = vand.u32 15, %v270_v4  ;;  %vm295_vm0 = vcmp.eq.s32.totalorder %v275_v5, 0  ;;  %vm1471_vm1 = vcmp.eq.s32.totalorder %v275_v5, 15 }
  0x13   : > { %vm296_vm2 = vcmp.eq.s32.totalorder %v282_v7, 0  ;;  %vm298_vm3 = vcmp.eq.s32.totalorder %v282_v7, 15  ;;  %325 = vrot.lane.b32.xlu1 %v1379_v10, %s1401_s27 }
  0x14   : > { %vm350_vm4 = vmpackc.low %vm296_vm2, %vm295_vm0 }
  0x15   : > { %v351_v12 = vsel %vm350_vm4, 65537, %v1400_v1  ;;  %vm370_vm5 = vmpackc.low %vm298_vm3, %vm1471_vm1  ;;  %vm429_vm3 = vcmask 261120  }
  0x16   : > { %v1480_v13 = vrot.slane %v351_v12, %v354_v8  ;;  %v1484_v15 = vrot.slane %v351_v12, %v358_v11  ;;  %v371_v16 = vsel %vm370_vm5, 65537, %v1400_v1  ;;  %vm414_vm5 = vcmask 146432  }
  0x17   : > { %321 = vrot.lane.b32.xlu1 %v1380_v14, %s1401_s27  ;;  %v379_v17 = vrot.slane %v371_v16, %v358_v11  ;;  %v375_v19 = vrot.slane %v371_v16, %v354_v8  ;;  %v1385_v8 = vld [vmem:[%s2062_s1 + $0x4] ss:$12 sps:$4 sm:$0xff]  }
  0x18   : > { %395 = vrot.lane.b32.xlu0 %v1480_v13, %s1402_s28  ;;  %758 = vmatprep.mubr.bf16.mxu0 %v1385_v8  ;;  %v667_v16 = vld [vmem:[%s2063_s2 + $0x10] sm:$0xff] }
  0x1b   : > { %382 = vrot.lane.b32.xlu1 %v379_v17, %s1403_s29 }
  0x1c   : > { %397 = vrot.lane.b32.xlu0 %v1484_v15, %s1402_s28 }
  0x1f   : > { %427 = vrot.lane.b32.xlu1 %v1484_v15, %s1404_s30 }
  0x20   : > { %319 = vrot.lane.b32.xlu0 %v1382_v18, %s1401_s27  ;;  %v666_v18 = vld [vmem:[%s2063_s2 + $0x8] sm:$0xff] }
  0x23   : > { %412 = vrot.lane.b32.xlu1 %v379_v17, %s1405_s7 }
  0x24   : > { %380 = vrot.lane.b32.xlu0 %v375_v19, %s1403_s29 }
  0x27   : > { %442 = vrot.lane.b32.xlu1 %v379_v17, %s1406_s8  ;;  %v668_v17 = vld [vmem:[%s2063_s2 + $0x18] sm:$0xff] }
  0x28   : > { %425 = vrot.lane.b32.xlu0 %v1480_v13, %s1404_s30  ;;  %s1806_s30 = scalar_lea.vmem %s2067_s6, %s1348_s26 }
  0x2c   : > { %410 = vrot.lane.b32.xlu0 %v375_v19, %s1405_s7 }
  0x30   : > { %440 = vrot.lane.b32.xlu0 %v375_v19, %s1406_s8  ;;  %v665_v19 = vld [vmem:[%s2063_s2] sm:$0xff] }
  0x81   : > { %v324_v20 = vpop.permute.xlu1 %323 }
  0x82   : > { %v1505_v25 = vsel %vm327_vm6, 0, %v324_v20 }
  0x85   : > { %v326_v21 = vpop.permute.xlu1 %325 }
  0x86   : > { %v1495_v23 = vsel %vm327_vm6, %v324_v20, %v326_v21  ;;  %v1498_v24 = vsel %vm327_vm6, %v326_v21, 0 }
  0x87   : > { %469 = vrot.lane.b32.xlu1 %v1498_v24, %s1407_s9  ;;  %467 = vrot.lane.b32.xlu0 %v1495_v23, %s1407_s9 }
  0x89   : > { %v322_v27 = vpop.permute.xlu1 %321 }
  0x8a   : > { %v1492_v22 = vpop.permute.xlu0 %395  ;;  %v1512_v28 = vsel %vm327_vm6, %v322_v27, 0 }
  0x8b   : > { %465 = vrot.lane.b32.xlu0 %v1505_v25, %s1407_s9  ;;  %vm401_vm7 = vcmp.ne.s16.totalorder %v1492_v22, 0 }
  0x8c   : > { %v407_v31 = vsel %vm401_vm7, 0, %v1505_v25 }
  0x8d   : > { %v1542_v36 = vpop.permute.xlu1 %382 }
  0x8e   : > { %v1507_v26 = vpop.permute.xlu0 %397  ;;  %vm388_vm11 = vcmp.ne.s16.totalorder %v1542_v36, 0 }
  0x8f   : > { %463 = vrot.lane.b32.xlu0 %v1512_v28, %s1407_s9  ;;  %vm403_vm8 = vcmp.ne.s16.totalorder %v1507_v26, 0  ;;  %v1555_v39 = vsel %vm399_vm10, %v1492_v22, %v1507_v26  ;;  %v391_v40 = vsel %vm388_vm11, 0, %v1512_v28  ;;  %v394_v41 = vsel %vm388_vm11, 0, %v1498_v24 }
  0x90   : > { %v406_v34 = vsel %vm403_vm8, 0, %v1512_v28  ;;  %v409_v35 = vsel %vm403_vm8, 0, %v1498_v24  ;;  %vm402_vm12 = vcmp.ne.s16.totalorder %v1555_v39, 0 }
  0x91   : > { %v408_v42 = vsel %vm402_vm12, 0, %v1495_v23  ;;  %v1604_v49 = vpop.permute.xlu1 %427 }
  0x92   : > { %v320_v29 = vpop.permute.xlu0 %319  ;;  %vm433_vm0 = vcmp.ne.s16.totalorder %v1604_v49, 0 }
  0x93   : > { %v1516_v30 = vsel %vm327_vm6, %v320_v29, %v322_v27  ;;  %v1527_v32 = vsel %vm327_vm6, 0, %v320_v29  ;;  %519 = vrot.lane.b32.xlu0 %v407_v31, %s1408_s10  ;;  %v436_v52 = vsel %vm433_vm0, 0, %v1512_v28  ;;  %v439_v53 = vsel %vm433_vm0, 0, %v1498_v24 }
  0x94   : > { %461 = vrot.lane.b32.xlu1 %v1516_v30, %s1407_s9  ;;  %v404_v38 = vsel %vm401_vm7, 0, %v1527_v32  ;;  %v405_v46 = vsel %vm402_vm12, 0, %v1516_v30 }
  0x95   : > { %v1624_v54 = vpop.permute.xlu1 %412 }
  0x96   : > { %v1530_v33 = vpop.permute.xlu0 %380  ;;  %vm2068_vm2 = vcmp.ne.s16.totalorder %v1624_v54, 0 }
  0x97   : > { %vm386_vm9 = vcmp.ne.s16.totalorder %v1530_v33, 0  ;;  %517 = vrot.lane.b32.xlu0 %v406_v34, %s1408_s10  ;;  %v1576_v44 = vsel %vm384_vm13, %v1530_v33, %v1542_v36  ;;  %v421_v57 = vsel %vm2068_vm2, 0, %v1512_v28  ;;  %v424_v58 = vsel %vm2068_vm2, 0, %v1498_v24 }
  0x98   : > { %459 = vrot.lane.b32.xlu1 %v1527_v32, %s1407_s9  ;;  %v392_v37 = vsel %vm386_vm9, 0, %v1505_v25  ;;  %v389_v43 = vsel %vm386_vm9, 0, %v1527_v32  ;;  %vm387_vm14 = vcmp.ne.s16.totalorder %v1576_v44, 0  ;;  %vm444_vm2 = vcmask 277504  }
  0x99   : > { %v393_v45 = vsel %vm387_vm14, 0, %v1495_v23  ;;  %v390_v48 = vsel %vm387_vm14, 0, %v1516_v30  ;;  %v1674_v2 = vpop.permute.xlu1 %442 }
  0x9a   : > { %v1594_v47 = vpop.permute.xlu0 %425 }
  0x9b   : > { %492 = vrot.lane.b32.xlu0 %v392_v37, %s1409_s11  ;;  %vm431_vm15 = vcmp.ne.s16.totalorder %v1594_v47, 0  ;;  %v1646_v59 = vsel %vm429_vm3, %v1594_v47, %v1604_v49 }
  0x9c   : > { %523 = vrot.lane.b32.xlu1 %v409_v35, %s1408_s10  ;;  %v437_v50 = vsel %vm431_vm15, 0, %v1505_v25  ;;  %v434_v56 = vsel %vm431_vm15, 0, %v1527_v32  ;;  %vm432_vm4 = vcmp.ne.s16.totalorder %v1646_v59, 0 }
  0x9d   : > { %v438_v61 = vsel %vm432_vm4, 0, %v1495_v23  ;;  %v435_v0 = vsel %vm432_vm4, 0, %v1516_v30 }
  0x9e   : > { %v1612_v51 = vpop.permute.xlu0 %410 }
  0x9f   : > { %490 = vrot.lane.b32.xlu0 %v391_v40, %s1409_s11  ;;  %vm2069_vm1 = vcmp.ne.s16.totalorder %v1612_v51, 0  ;;  %v1662_v62 = vsel %vm414_vm5, %v1612_v51, %v1624_v54  ;;  %vm2070_vm5 = vcmp.ne.s16.totalorder %v1674_v2, 0 }
  0xa0   : > { %513 = vrot.lane.b32.xlu1 %v404_v38, %s1408_s10  ;;  %v422_v55 = vsel %vm2069_vm1, 0, %v1505_v25  ;;  %v419_v60 = vsel %vm2069_vm1, 0, %v1527_v32  ;;  %vm417_vm10 = vcmp.ne.s16.totalorder %v1662_v62, 0  ;;  %v454_v6 = vsel %vm2070_vm5, 0, %v1498_v24 }
  0xa1   : > { %v423_v4 = vsel %vm417_vm10, 0, %v1495_v23  ;;  %v420_v9 = vsel %vm417_vm10, 0, %v1516_v30  ;;  %v451_v11 = vsel %vm2070_vm5, 0, %v1512_v28  ;;  %vm2073_vm5 = vcmask 1031168  }
  0xa2   : > { %v1666_v63 = vpop.permute.xlu0 %440 }
  0xa3   : > { %521 = vrot.lane.b32.xlu0 %v408_v42, %s1408_s10  ;;  %vm2075_vm13 = vcmp.ne.s16.totalorder %v1666_v63, 0  ;;  %v1695_v7 = vsel %vm444_vm2, %v1666_v63, %v1674_v2  ;;  %vm2072_vm2 = vcmask 916480  }
  0xa4   : > { %496 = vrot.lane.b32.xlu1 %v394_v41, %s1409_s11  ;;  %v452_v5 = vsel %vm2075_vm13, 0, %v1505_v25  ;;  %vm2071_vm1 = vcmp.ne.s16.totalorder %v1695_v7, 0  ;;  %v449_v14 = vsel %vm2075_vm13, 0, %v1527_v32  ;;  %vm600_vm13 = vcmask 785408  }
  0xa5   : > { %v453_v10 = vsel %vm2071_vm1, 0, %v1495_v23  ;;  %v450_v12 = vsel %vm2071_vm1, 0, %v1516_v30  ;;  %vm2074_vm1 = vcmask 1039360  }
  0xa7   : > { %617 = vrot.lane.b32.xlu0 %v1495_v23, %s1410_s12 }
  0xa8   : > { %486 = vrot.lane.b32.xlu1 %v389_v43, %s1409_s11 }
  0xab   : > { %494 = vrot.lane.b32.xlu0 %v393_v45, %s1409_s11 }
  0xac   : > { %619 = vrot.lane.b32.xlu1 %v1498_v24, %s1410_s12 }
  0xaf   : > { %615 = vrot.lane.b32.xlu0 %v1505_v25, %s1410_s12 }
  0xb0   : > { %515 = vrot.lane.b32.xlu1 %v405_v46, %s1408_s10 }
  0xb3   : > { %613 = vrot.lane.b32.xlu0 %v1512_v28, %s1410_s12 }
  0xb4   : > { %611 = vrot.lane.b32.xlu1 %v1516_v30, %s1410_s12 }
  0xb7   : > { %594 = vrot.lane.b32.xlu0 %v437_v50, %s1411_s13 }
  0xb8   : > { %488 = vrot.lane.b32.xlu1 %v390_v48, %s1409_s11 }
  0xbb   : > { %592 = vrot.lane.b32.xlu0 %v436_v52, %s1411_s13 }
  0xbc   : > { %609 = vrot.lane.b32.xlu1 %v1527_v32, %s1410_s12 }
  0xbf   : > { %567 = vrot.lane.b32.xlu0 %v422_v55, %s1412_s14 }
  0xc0   : > { %598 = vrot.lane.b32.xlu1 %v439_v53, %s1411_s13 }
  0xc3   : > { %565 = vrot.lane.b32.xlu0 %v421_v57, %s1412_s14 }
  0xc4   : > { %588 = vrot.lane.b32.xlu1 %v434_v56, %s1411_s13 }
  0xc7   : > { %542 = vrot.lane.b32.xlu0 %v1495_v23, %s1413_s15 }
  0xc8   : > { %571 = vrot.lane.b32.xlu1 %v424_v58, %s1412_s14 }
  0xcb   : > { %596 = vrot.lane.b32.xlu0 %v438_v61, %s1411_s13 }
  0xcc   : > { %561 = vrot.lane.b32.xlu1 %v419_v60, %s1412_s14 }
  0xcf   : > { %540 = vrot.lane.b32.xlu0 %v1505_v25, %s1413_s15 }
  0xd0   : > { %544 = vrot.lane.b32.xlu1 %v1498_v24, %s1413_s15 }
  0xd3   : > { %569 = vrot.lane.b32.xlu0 %v423_v4, %s1412_s14 }
  0xd4   : > { %590 = vrot.lane.b32.xlu1 %v435_v0, %s1411_s13 }
  0xd7   : > { %646 = vrot.lane.b32.xlu0 %v454_v6, %s1414_s16 }
  0xd8   : > { %642 = vrot.lane.b32.xlu1 %v452_v5, %s1414_s16 }
  0xdb   : > { %536 = vrot.lane.b32.xlu0 %v1516_v30, %s1413_s15 }
  0xdc   : > { %538 = vrot.lane.b32.xlu1 %v1512_v28, %s1413_s15 }
  0xdf   : > { %534 = vrot.lane.b32.xlu0 %v1527_v32, %s1413_s15 }
  0xe0   : > { %563 = vrot.lane.b32.xlu1 %v420_v9, %s1412_s14 }
  0xe3   : > { %640 = vrot.lane.b32.xlu0 %v451_v11, %s1414_s16 }
  0xe4   : > { %644 = vrot.lane.b32.xlu1 %v453_v10, %s1414_s16 }
  0xe7   : > { %681 = vperm.xlu0 %1375, %v667_v16  }
  0xe8   : > { %638 = vrot.lane.b32.xlu1 %v450_v12, %s1414_s16 }
  0xeb   : > { %676 = vperm.xlu0 %1375, %v666_v18  }
  0xec   : > { %636 = vrot.lane.b32.xlu1 %v449_v14, %s1414_s16 }
  0xf0   : > { %686 = vperm.xlu1 %1376, %v668_v17  }
  0xf4   : > { %671 = vperm.xlu1 %1376, %v665_v19  }
  0xf9   : > { %v468_v20 = vpop.permute.xlu0 %467  ;;  %v470_v24 = vpop.permute.xlu1 %469 }
  0xfa   : > { %v475_v8 = vsel %vm2074_vm1, %v468_v20, %v470_v24 }
  0xfd   : > { %v466_v21 = vpop.permute.xlu0 %465 }
  0xfe   : > { %v474_v11 = vsel %vm2074_vm1, %v466_v21, %v468_v20 }
 0x101   : > { %v464_v27 = vpop.permute.xlu0 %463 }
 0x105   : > { %v520_v29 = vpop.permute.xlu0 %519 }
 0x106   : > { %v462_v28 = vpop.permute.xlu1 %461 }
 0x107   : > { %v473_v12 = vsel %vm2074_vm1, %v462_v28, %v464_v27 }
 0x109   : > { %v518_v34 = vpop.permute.xlu0 %517 }
 0x10a   : > { %v460_v31 = vpop.permute.xlu1 %459 }
 0x10b   : > { %v472_v17 = vsel %vm2074_vm1, %v460_v31, %v462_v28  ;;  %vm2077_vm1 = vcmask 777216  }
 0x10d   : > { %v493_v37 = vpop.permute.xlu0 %492 }
 0x10e   : > { %v524_v35 = vpop.permute.xlu1 %523 }
 0x111   : > { %v491_v40 = vpop.permute.xlu0 %490 }
 0x112   : > { %v514_v38 = vpop.permute.xlu1 %513 }
 0x115   : > { %v522_v42 = vpop.permute.xlu0 %521 }
 0x116   : > { %v497_v41 = vpop.permute.xlu1 %496  ;;  %v529_v45 = vsel %vm2072_vm2, %v522_v42, %v524_v35  ;;  %v528_v46 = vsel %vm2072_vm2, %v520_v29, %v522_v42 }
 0x117   : > { %726 = vmatprep.subr.bf16.mxu0 %v529_v45 }
 0x118   : > { %727 = vmatpush1.bf16.msra.mxu0 %v528_v46 }
 0x119   : > { %v618_v48 = vpop.permute.xlu0 %617 }
 0x11a   : > { %v487_v43 = vpop.permute.xlu1 %486 }
 0x11d   : > { %v495_v52 = vpop.permute.xlu0 %494 }
 0x11e   : > { %v620_v50 = vpop.permute.xlu1 %619  ;;  %v502_v57 = vsel %vm2073_vm5, %v495_v52, %v497_v41  ;;  %v501_v61 = vsel %vm2073_vm5, %v493_v37, %v495_v52 }
 0x11f   : > { %v625_v24 = vsel %vm2077_vm1, %v618_v48, %v620_v50 }
 0x121   : > { %v616_v58 = vpop.permute.xlu0 %615 }
 0x122   : > { %v516_v53 = vpop.permute.xlu1 %515  ;;  %v624_v28 = vsel %vm2077_vm1, %v616_v58, %v618_v48 }
 0x123   : > { %v527_v55 = vsel %vm2072_vm2, %v516_v53, %v518_v34  ;;  %v526_v56 = vsel %vm2072_vm2, %v514_v38, %v516_v53  ;;  %vm2078_vm2 = vcmp.eq.s16.totalorder %v1484_v15, 0 }
 0x124   : > { %728 = vmatprep.subr.bf16.mxu0 %v527_v55 }
 0x125   : > { %729 = vmatpush1.bf16.msra.mxu0 %v526_v56  ;;  %v614_v0 = vpop.permute.xlu0 %613 }
 0x126   : > { %v612_v60 = vpop.permute.xlu1 %611  ;;  %730 = vmatprep.subr.bf16.mxu0 %v502_v57 }
 0x129   : > { %731 = vmatpush1.bf16.msra.mxu0 %v501_v61  ;;  %v595_v9 = vpop.permute.xlu0 %594 }
 0x12a   : > { %v489_v4 = vpop.permute.xlu1 %488 }
 0x12b   : > { %v500_v5 = vsel %vm2073_vm5, %v489_v4, %v491_v40  ;;  %v499_v6 = vsel %vm2073_vm5, %v487_v43, %v489_v4  ;;  %vm2076_vm5 = vcmp.eq.s16.totalorder %v1480_v13, 0 }
 0x12c   : > { %732 = vmatprep.subr.bf16.mxu0 %v500_v5 }
 0x12d   : > { %733 = vmatpush1.bf16.msra.mxu0 %v499_v6  ;;  %v593_v14 = vpop.permute.xlu0 %592 }
 0x12e   : > { %v610_v10 = vpop.permute.xlu1 %609  ;;  %734 = vmatprep.subr.bf16.mxu0 %v475_v8 }
 0x131   : > { %735 = vmatpush1.bf16.msra.mxu0 %v474_v11  ;;  %v568_v18 = vpop.permute.xlu0 %567  ;;  %v1387_v11 = vld [vmem:[%s2062_s1 + $0x1c] ss:$12 sps:$4 sm:$0xff]  }
 0x132   : > { %v599_v16 = vpop.permute.xlu1 %598  ;;  %736 = vmatprep.subr.bf16.mxu0 %v473_v12 }
 0x135   : > { %737 = vmatpush1.bf16.msra.mxu0 %v472_v17  ;;  %v566_v20 = vpop.permute.xlu0 %565  ;;  %v1389_v17 = vld [vmem:[%s2062_s1 + $0x18] ss:$12 sps:$4 sm:$0xff]  }
 0x136   : > { %v589_v19 = vpop.permute.xlu1 %588  ;;  %1326 = vmatprep.subr.msk.bf16.mxu0 %vm2078_vm2, %v1495_v23 }
 0x139   : > { %1328 = vmatpush1.bf16.msk.msra.mxu0 %vm2076_vm5, %v1505_v25  ;;  %v543_v23 = vpop.permute.xlu0 %542  ;;  %v623_v25 = vsel %vm2077_vm1, %v612_v60, %v614_v0 }
 0x13a   : > { %v572_v21 = vpop.permute.xlu1 %571  ;;  %1330 = vmatprep.subr.msk.bf16.mxu0 %vm2078_vm2, %v1516_v30  ;;  %v622_v30 = vsel %vm2077_vm1, %v610_v10, %v612_v60  ;;  %vm546_vm1 = vcmask 908288   ;;  %vm648_vm2 = vcmask 769024   ;;  %v1383_v10 = vld [vmem:[%s2062_s1] ss:$12 sps:$4 sm:$0xff]  }
 0x13d   : > { %1332 = vmatpush1.bf16.msk.msra.mxu0 %vm2076_vm5, %v1527_v32  ;;  %v597_v29 = vpop.permute.xlu0 %596  ;;  %vm573_vm5 = vcmask 900096  }
 0x13e   : > { %v562_v27 = vpop.permute.xlu1 %561  ;;  %742 = vmatprep.subr.bf16.mxu0 %v625_v24  ;;  %v604_v34 = vsel %vm600_vm13, %v597_v29, %v599_v16  ;;  %v603_v37 = vsel %vm600_vm13, %v595_v9, %v597_v29  ;;  %v1386_v16 = vld [vmem:[%s2062_s1 + $0x8] ss:$12 sps:$4 sm:$0xff]  }
 0x141   : > { %743 = vmatpush2.bf16.msra.mxu0 %v624_v28  ;;  %v541_v32 = vpop.permute.xlu0 %540 }
 0x142   : > { %v545_v31 = vpop.permute.xlu1 %544  ;;  %744 = vmatprep.subr.bf16.mxu0 %v623_v25  ;;  %v549_v0 = vsel %vm546_vm1, %v541_v32, %v543_v23 }
 0x143   : > { %v550_v56 = vsel %vm546_vm1, %v543_v23, %v545_v31 }
 0x145   : > { %745 = vmatpush2.bf16.msra.mxu0 %v622_v30  ;;  %v570_v40 = vpop.permute.xlu0 %569 }
 0x146   : > { %v591_v35 = vpop.permute.xlu1 %590  ;;  %746 = vmatprep.subr.bf16.mxu0 %v604_v34  ;;  %v577_v43 = vsel %vm573_vm5, %v570_v40, %v572_v21  ;;  %v576_v48 = vsel %vm573_vm5, %v568_v18, %v570_v40  ;;  %v1390_v18 = vld [vmem:[%s2062_s1 + $0x20] ss:$12 sps:$4 sm:$0xff]  }
 0x147   : > { %v602_v38 = vsel %vm600_vm13, %v591_v35, %v593_v14  ;;  %v601_v42 = vsel %vm600_vm13, %v589_v19, %v591_v35 }
 0x149   : > { %747 = vmatpush2.bf16.msra.mxu0 %v603_v37  ;;  %v647_v45 = vpop.permute.xlu0 %646 }
 0x14a   : > { %v643_v41 = vpop.permute.xlu1 %642  ;;  %748 = vmatprep.subr.bf16.mxu0 %v602_v38 }
 0x14d   : > { %749 = vmatpush2.bf16.msra.mxu0 %v601_v42  ;;  %v537_v50 = vpop.permute.xlu0 %536 }
 0x14e   : > { %v539_v46 = vpop.permute.xlu1 %538  ;;  %750 = vmatprep.subr.bf16.mxu0 %v577_v43 }
 0x14f   : > { %v548_v4 = vsel %vm546_vm1, %v537_v50, %v539_v46 }
 0x151   : > { %751 = vmatpush2.bf16.msra.mxu0 %v576_v48  ;;  %v535_v57 = vpop.permute.xlu0 %534 }
 0x152   : > { %v564_v52 = vpop.permute.xlu1 %563  ;;  %v547_v9 = vsel %vm546_vm1, %v535_v57, %v537_v50 }
 0x153   : > { %v575_v53 = vsel %vm573_vm5, %v564_v52, %v566_v20  ;;  %v574_v55 = vsel %vm573_vm5, %v562_v27, %v564_v52 }
 0x154   : > { %752 = vmatprep.subr.bf16.mxu0 %v575_v53 }
 0x155   : > { %753 = vmatpush2.bf16.msra.mxu0 %v574_v55  ;;  %v641_v5 = vpop.permute.xlu0 %640 }
 0x156   : > { %v645_v58 = vpop.permute.xlu1 %644  ;;  %754 = vmatprep.subr.bf16.mxu0 %v550_v56 }
 0x157   : > { %v652_v60 = vsel %vm648_vm2, %v645_v58, %v647_v45  ;;  %v651_v61 = vsel %vm648_vm2, %v643_v41, %v645_v58 }
 0x158   : > { %791 = vmatprep.subr.bf16.mxu1 %v652_v60 }
 0x159   : > { %755 = vmatpush2.bf16.msra.mxu0 %v549_v0  ;;  %792 = vmatpush1.bf16.msra.mxu1 %v651_v61 }
 0x15a   : > { %v639_v6 = vpop.permute.xlu1 %638  ;;  %756 = vmatprep.subr.bf16.mxu0 %v548_v4 }
 0x15b   : > { %v650_v8 = vsel %vm648_vm2, %v639_v6, %v641_v5 }
 0x15c   : > { %793 = vmatprep.subr.bf16.mxu1 %v650_v8 }
 0x15d   : > { %757 = vmatpush2.bf16.msra.mxu0 %v547_v9 }
 0x15e   : > { %v637_v12 = vpop.permute.xlu1 %636 }
 0x15f   : > { %v649_v14 = vsel %vm648_vm2, %v637_v12, %v639_v6 }
 0x160   : > { %759 = vmatmul.mubr.bf16.vlgmr.msra.gmra.mxu0 %v1383_v10  ;;  %794 = vmatpush1.bf16.msra.mxu1 %v649_v14 }
 0x161   : > { %768 = vmatprep.mubr.bf16.mxu0 %v1387_v11 }
 0x162   : > { %v682_v20 = vpop.permute.xlu0 %681 }
 0x163   : > { %1333 = vmatmul.mubr.msk.bf16.vlgmr.msra.gmra.mxu1 %vm429_vm3, %v1386_v16 }
 0x164   : > { %821 = vmatprep.mubr.bf16.mxu1 %v1400_v1 }
 0x166   : > { %v677_v28 = vpop.permute.xlu0 %676 }
 0x168   : > { %769 = vmatmul.mubr.bf16.gmra.mxu0 %v1389_v17 }
 0x169   : > { %1202 = vmatprep.mubr.bf16.mxu0 %v1400_v1 }
 0x16b   : > { %1334 = vmatmul.mubr.msk.bf16.gmra.mxu1 %vm429_vm3, %v1390_v18  ;;  %v687_v19 = vpop.permute.xlu1 %686 }
 0x16f   : > { %v672_v21 = vpop.permute.xlu1 %671 }
 0x220   : > { %v760_v24 = vpop.f32.mrf.mxu0 }
 0x221   : > { %v761_v23 = vadd.f32 %v760_v24, %v672_v21 }
 0x222   : > { %v762_v27 = vpop.f32.mrf.mxu0 }
 0x223   : > { %v763_v25 = vadd.f32 %v762_v27, %v672_v21  ;;  %v813_v1 = vpop.f32.mrf.mxu1 }
 0x224   : > { %v814_v29 = vadd.f32 %v813_v1, %v761_v23  ;;  %v764_v31 = vpop.f32.mrf.mxu0 }
 0x225   : > { %v765_v30 = vadd.f32 %v764_v31, %v677_v28  ;;  %v815_v34 = vpop.f32.mrf.mxu1 }
 0x226   : > { %832 = vst [vmem:[%s1806_s30] sm:$0xff] %v814_v29  ;;  %v816_v32 = vadd.f32 %v815_v34, %v763_v25  ;;  %v766_v35 = vpop.f32.mrf.mxu0 }
 0x227   : > { %v767_v37 = vadd.f32 %v766_v35, %v677_v28  ;;  %v817_v38 = vpop.f32.mrf.mxu1 }
 0x228   : > { %833 = vst [vmem:[%s1806_s30 + $0x8] sm:$0xff] %v816_v32  ;;  %v818_v40 = vadd.f32 %v817_v38, %v765_v30  ;;  %v770_v41 = vpop.f32.mrf.mxu0 }
 0x229   : > { %v771_v42 = vadd.f32 %v770_v41, %v682_v20  ;;  %v819_v43 = vpop.f32.mrf.mxu1 }
 0x22a   : > { %834 = vst [vmem:[%s1806_s30 + $0x10] sm:$0xff] %v818_v40  ;;  %v820_v45 = vadd.f32 %v819_v43, %v767_v37  ;;  %v772_v46 = vpop.f32.mrf.mxu0  ;;  %v840_v9 = vpack.c.bf16 %v818_v40, %v814_v29 }
 0x22b   : > { %v773_v48 = vadd.f32 %v772_v46, %v682_v20  ;;  %v823_v50 = vpop.f32.mrf.mxu1  ;;  %v1100_v46 = vld [vmem:[%s2064_s3] sm:$0x3f] }
 0x22c   : > { %835 = vst [vmem:[%s1806_s30 + $0x18] sm:$0xff] %v820_v45  ;;  %v824_v52 = vadd.f32 %v823_v50, %v771_v42  ;;  %v774_v53 = vpop.f32.mrf.mxu0  ;;  %v841_v10 = vpack.c.bf16 %v820_v45, %v816_v32  ;;  %v1415_v42 = vmov 1983009808  }
 0x22d   : > { %v775_v55 = vadd.f32 %v774_v53, %v687_v19  ;;  %v825_v56 = vpop.f32.mrf.mxu1  ;;  %v1110_v43 = vunpack.c.l.s4 %v1415_v42 }
 0x22e   : > { %836 = vst [vmem:[%s1806_s30 + $0x20] sm:$0xff] %v824_v52  ;;  %v826_v57 = vadd.f32 %v825_v56, %v773_v48  ;;  %v776_v58 = vpop.f32.mrf.mxu0 }
 0x22f   : > { %v777_v60 = vadd.f32 %v776_v58, %v687_v19  ;;  %v827_v61 = vpop.f32.mrf.mxu1  ;;  %v1111_v45 = vunpack.c.0.s8 %v1110_v43 }
 0x230   : > { %837 = vst [vmem:[%s1806_s30 + $0x28] sm:$0xff] %v826_v57  ;;  %v828_v0 = vadd.f32 %v827_v61, %v775_v55 }
 0x231   : > { %v829_v4 = vpop.f32.mrf.mxu1  ;;  %v1114_v48 = vsub.s32 %v1111_v45, %v1464_v3 }
 0x232   : > { %838 = vst [vmem:[%s1806_s30 + $0x30] sm:$0xff] %v828_v0  ;;  %v842_v5 = vpack.c.bf16 %v828_v0, %v824_v52  ;;  %v830_v6 = vadd.f32 %v829_v4, %v777_v60 }
 0x233   : > { %v1979_v50 = vrot.slane %v1100_v46, %v1114_v48 }
 0x234   : > { %839 = vst [vmem:[%s1806_s30 + $0x38] sm:$0xff] %v830_v6  ;;  %v843_v8 = vpack.c.bf16 %v830_v6, %v826_v57  ;;  %852 = vrot.lane.b32.xlu1 %v842_v5, %s1401_s27  ;;  %v1101_v57 = vld [vmem:[%s2065_s4] sm:$0xf] }
 0x235   : > { %v1123_v53 = vcombine.high %v1979_v50, %v1979_v50 }
 0x236   : > { %854 = vrot.lane.b32.xlu0 %v843_v8, %s1401_s27 }
 0x237   : > { %1161 = vmatprep.mubr.bf16.mxu1 %v1123_v53 }
 0x238   : > { %848 = vrot.lane.b32.xlu1 %v840_v9, %s1401_s27 }
 0x23a   : > { %850 = vrot.lane.b32.xlu0 %v841_v10, %s1401_s27 }
 0x2a6   : > { %v853_v11 = vpop.permute.xlu1 %852 }
 0x2a7   : > { %v1852_v27 = vsel %vm327_vm6, 0, %v853_v11 }
 0x2a8   : > { %v855_v12 = vpop.permute.xlu0 %854  ;;  %v885_v25 = vsel %vm401_vm7, 0, %v1852_v27  ;;  %v879_v29 = vsel %vm386_vm9, 0, %v1852_v27  ;;  %v897_v39 = vsel %vm431_vm15, 0, %v1852_v27 }
 0x2a9   : > { %v1873_v31 = vsel %vm327_vm6, %v855_v12, 0  ;;  %v1878_v22 = vsel %vm327_vm6, %v853_v11, %v855_v12 }
 0x2aa   : > { %v849_v14 = vpop.permute.xlu1 %848  ;;  %v887_v30 = vsel %vm403_vm8, 0, %v1873_v31  ;;  %v886_v33 = vsel %vm402_vm12, 0, %v1878_v22  ;;  %v881_v34 = vsel %vm388_vm11, 0, %v1873_v31  ;;  %v880_v26 = vsel %vm387_vm14, 0, %v1878_v22 }
 0x2ab   : > { %v1821_v16 = vsel %vm327_vm6, 0, %v849_v14  ;;  %v899_v40 = vsel %vm433_vm0, 0, %v1873_v31  ;;  %v892_v59 = vsel %vm417_vm10, 0, %v1878_v22 }
 0x2ac   : > { %910 = vrot.lane.b32.xlu0 %v1821_v16, %s1407_s9  ;;  %v851_v17 = vpop.permute.xlu0 %850  ;;  %v882_v19 = vsel %vm401_vm7, 0, %v1821_v16  ;;  %v876_v21 = vsel %vm386_vm9, 0, %v1821_v16  ;;  %v894_v44 = vsel %vm431_vm15, 0, %v1821_v16  ;;  %vm2084_vm9 = vcmp.ne.s16.totalorder %v1666_v63, 0 }
 0x2ad   : > { %v1826_v18 = vsel %vm327_vm6, %v851_v17, 0  ;;  %v1847_v23 = vsel %vm327_vm6, %v849_v14, %v851_v17  ;;  %vm2081_vm6 = vcmp.ne.s16.totalorder %v1612_v51, 0  ;;  %v898_v51 = vsel %vm432_vm4, 0, %v1878_v22 }
 0x2ae   : > { %914 = vrot.lane.b32.xlu1 %v1826_v18, %s1407_s9  ;;  %v884_v20 = vsel %vm403_vm8, 0, %v1826_v18  ;;  %v878_v24 = vsel %vm388_vm11, 0, %v1826_v18  ;;  %v883_v28 = vsel %vm402_vm12, 0, %v1847_v23  ;;  %v877_v1 = vsel %vm387_vm14, 0, %v1847_v23  ;;  %vm2082_vm7 = vmmov %vm2081_vm6 }
 0x2af   : > { %v895_v36 = vsel %vm432_vm4, 0, %v1847_v23  ;;  %v896_v32 = vsel %vm433_vm0, 0, %v1826_v18  ;;  %v889_v35 = vsel %vm417_vm10, 0, %v1847_v23  ;;  %v891_v37 = vsel %vm2081_vm6, 0, %v1852_v27  ;;  %vm2089_vm0 = vmmov %vm2084_vm9 }
 0x2b0   : > { %962 = vrot.lane.b32.xlu0 %v882_v19, %s1408_s10  ;;  %v888_v47 = vsel %vm2082_vm7, 0, %v1821_v16  ;;  %vm2083_vm8 = vcmp.ne.s16.totalorder %v1624_v54, 0  ;;  %v903_v41 = vsel %vm2084_vm9, 0, %v1852_v27  ;;  %v1108_v54 = vcombine.high %v1100_v46, %v1100_v46 }
 0x2b1   : > { %v890_v38 = vsel %vm2083_vm8, 0, %v1826_v18  ;;  %vm2085_vm11 = vmmov %vm2083_vm8  ;;  %vm2086_vm12 = vcmp.ne.s16.totalorder %v1695_v7, 0  ;;  %vm2088_vm15 = vcmp.ne.s16.totalorder %v1674_v2, 0  ;;  %v900_v56 = vsel %vm2089_vm0, 0, %v1821_v16 }
 0x2b2   : > { %966 = vrot.lane.b32.xlu1 %v884_v20, %s1408_s10  ;;  %v893_v49 = vsel %vm2085_vm11, 0, %v1873_v31  ;;  %v904_v62 = vsel %vm2086_vm12, 0, %v1878_v22  ;;  %v1981_v52 = vrot.slane %v1108_v54, %v1114_v48  ;;  %vm2087_vm14 = vmmov %vm2086_vm12  ;;  %v905_v55 = vsel %vm2088_vm15, 0, %v1873_v31 }
 0x2b3   : > { %v901_v3 = vsel %vm2087_vm14, 0, %v1847_v23  ;;  %vm2090_vm4 = vmmov %vm2088_vm15  ;;  %vm2091_vm10 = vcmask 916480   ;;  %vm2095_vm9 = vcmask 1031168   ;;  %vm2099_vm15 = vcmask 1039360  }
 0x2b4   : > { %936 = vrot.lane.b32.xlu0 %v876_v21, %s1409_s11  ;;  %v902_v7 = vsel %vm2090_vm4, 0, %v1826_v18  ;;  %vm2092_vm6 = vmmov %vm2091_vm10 }
 0x2b5   : > { %vm2093_vm7 = vmmov %vm2092_vm6 }
 0x2b6   : > { %940 = vrot.lane.b32.xlu1 %v878_v24, %s1409_s11  ;;  %vm2094_vm8 = vmmov %vm2092_vm6 }
 0x2b7   : > { %vm2096_vm11 = vmmov %vm2095_vm9 }
 0x2b8   : > { %912 = vrot.lane.b32.xlu0 %v1847_v23, %s1407_s9  ;;  %vm2097_vm12 = vmmov %vm2095_vm9 }
 0x2b9   : > { %vm2098_vm14 = vmmov %vm2095_vm9 }
 0x2ba   : > { %916 = vrot.lane.b32.xlu1 %v1852_v27, %s1407_s9  ;;  %vm2100_vm0 = vmmov %vm2099_vm15 }
 0x2bb   : > { %vm2101_vm4 = vmmov %vm2100_vm0 }
 0x2bc   : > { %964 = vrot.lane.b32.xlu0 %v883_v28, %s1408_s10 }
 0x2be   : > { %968 = vrot.lane.b32.xlu1 %v885_v25, %s1408_s10 }
 0x2c0   : > { %938 = vrot.lane.b32.xlu0 %v877_v1, %s1409_s11 }
 0x2c2   : > { %942 = vrot.lane.b32.xlu1 %v879_v29, %s1409_s11 }
 0x2c4   : > { %920 = vrot.lane.b32.xlu0 %v1873_v31, %s1407_s9 }
 0x2c6   : > { %918 = vrot.lane.b32.xlu1 %v1878_v22, %s1407_s9 }
 0x2c8   : > { %972 = vrot.lane.b32.xlu0 %v887_v30, %s1408_s10 }
 0x2ca   : > { %970 = vrot.lane.b32.xlu1 %v886_v33, %s1408_s10 }
 0x2cc   : > { %1064 = vrot.lane.b32.xlu0 %v1873_v31, %s1410_s12 }
 0x2ce   : > { %1062 = vrot.lane.b32.xlu1 %v1878_v22, %s1410_s12 }
 0x2d0   : > { %946 = vrot.lane.b32.xlu0 %v881_v34, %s1409_s11 }
 0x2d2   : > { %944 = vrot.lane.b32.xlu1 %v880_v26, %s1409_s11 }
 0x2d4   : > { %1056 = vrot.lane.b32.xlu0 %v1847_v23, %s1410_s12 }
 0x2d6   : > { %1060 = vrot.lane.b32.xlu1 %v1852_v27, %s1410_s12 }
 0x2d8   : > { %1054 = vrot.lane.b32.xlu0 %v1821_v16, %s1410_s12 }
 0x2da   : > { %1058 = vrot.lane.b32.xlu1 %v1826_v18, %s1410_s12  ;;  %s1347_s12 = sshll.u32 %s2112_s22, 3 }
 0x2dc   : > { %1036 = vrot.lane.b32.xlu0 %v895_v36, %s1411_s13 }
 0x2de   : > { %1040 = vrot.lane.b32.xlu1 %v897_v39, %s1411_s13 }
 0x2e0   : > { %1034 = vrot.lane.b32.xlu0 %v894_v44, %s1411_s13 }
 0x2e2   : > { %1038 = vrot.lane.b32.xlu1 %v896_v32, %s1411_s13 }
 0x2e4   : > { %1010 = vrot.lane.b32.xlu0 %v889_v35, %s1412_s14 }
 0x2e6   : > { %1014 = vrot.lane.b32.xlu1 %v891_v37, %s1412_s14 }
 0x2e8   : > { %1008 = vrot.lane.b32.xlu0 %v888_v47, %s1412_s14 }
 0x2ea   : > { %1012 = vrot.lane.b32.xlu1 %v890_v38, %s1412_s14 }
 0x2ec   : > { %992 = vrot.lane.b32.xlu0 %v1873_v31, %s1413_s15 }
 0x2ee   : > { %990 = vrot.lane.b32.xlu1 %v1878_v22, %s1413_s15 }
 0x2f0   : > { %1044 = vrot.lane.b32.xlu0 %v899_v40, %s1411_s13 }
 0x2f2   : > { %1042 = vrot.lane.b32.xlu1 %v898_v51, %s1411_s13 }
 0x2f4   : > { %1086 = vrot.lane.b32.xlu0 %v903_v41, %s1414_s16 }
 0x2f6   : > { %988 = vrot.lane.b32.xlu1 %v1852_v27, %s1413_s15 }
 0x2f8   : > { %1018 = vrot.lane.b32.xlu0 %v893_v49, %s1412_s14 }
 0x2fa   : > { %1016 = vrot.lane.b32.xlu1 %v892_v59, %s1412_s14 }
 0x2fc   : > { %986 = vrot.lane.b32.xlu0 %v1826_v18, %s1413_s15 }
 0x2fe   : > { %984 = vrot.lane.b32.xlu1 %v1847_v23, %s1413_s15 }
 0x300   : > { %1088 = vrot.lane.b32.xlu0 %v904_v62, %s1414_s16 }
 0x302   : > { %982 = vrot.lane.b32.xlu1 %v1821_v16, %s1413_s15  ;;  %s259_s15 = scalar_lea.vmem %s2066_s5, %s1347_s12 }
 0x304   : > { %1082 = vrot.lane.b32.xlu0 %v901_v3, %s1414_s16 }
 0x306   : > { %1090 = vrot.lane.b32.xlu1 %v905_v55, %s1414_s16 }
 0x308   : > { %1080 = vrot.lane.b32.xlu0 %v900_v56, %s1414_s16 }
 0x30a   : > { %1084 = vrot.lane.b32.xlu1 %v902_v7, %s1414_s16 }
 0x30e   : > { %1104 = vperm.xlu1 %1376, %v1101_v57  }
 0x31e   : > { %v911_v58 = vpop.permute.xlu0 %910 }
 0x320   : > { %v915_v60 = vpop.permute.xlu1 %914 }
 0x322   : > { %v963_v61 = vpop.permute.xlu0 %962 }
 0x324   : > { %v967_v0 = vpop.permute.xlu1 %966 }
 0x326   : > { %v937_v4 = vpop.permute.xlu0 %936 }
 0x328   : > { %v941_v63 = vpop.permute.xlu1 %940 }
 0x32a   : > { %v913_v5 = vpop.permute.xlu0 %912 }
 0x32b   : > { %v923_v37 = vsel %vm2101_vm4, %v913_v5, %v915_v60 }
 0x32c   : > { %v917_v6 = vpop.permute.xlu1 %916 }
 0x32e   : > { %v965_v8 = vpop.permute.xlu0 %964 }
 0x32f   : > { %v975_v21 = vsel %vm2093_vm7, %v965_v8, %v967_v0  ;;  %v974_v28 = vsel %vm2094_vm8, %v963_v61, %v965_v8  ;;  %vm2104_vm7 = vcmp.eq.s16.totalorder %v1480_v13, 0 }
 0x330   : > { %v969_v9 = vpop.permute.xlu1 %968 }
 0x332   : > { %v939_v10 = vpop.permute.xlu0 %938 }
 0x333   : > { %v949_v33 = vsel %vm2097_vm12, %v939_v10, %v941_v63  ;;  %v948_v26 = vsel %vm2098_vm14, %v937_v4, %v939_v10 }
 0x334   : > { %v943_v2 = vpop.permute.xlu1 %942 }
 0x336   : > { %v921_v11 = vpop.permute.xlu0 %920 }
 0x338   : > { %v919_v12 = vpop.permute.xlu1 %918 }
 0x339   : > { %v925_v39 = vsel %vm2099_vm15, %v919_v12, %v921_v11  ;;  %v924_v32 = vsel %vm2100_vm0, %v917_v6, %v919_v12 }
 0x33a   : > { %v973_v14 = vpop.permute.xlu0 %972 }
 0x33c   : > { %v971_v17 = vpop.permute.xlu1 %970 }
 0x33d   : > { %v976_v18 = vsel %vm2091_vm10, %v969_v9, %v971_v17  ;;  %v977_v19 = vsel %vm2092_vm6, %v971_v17, %v973_v14  ;;  %vm2102_vm10 = vmmov %vm2100_vm0  ;;  %vm2103_vm6 = vcmp.eq.s16.totalorder %v1484_v15, 0 }
 0x33e   : > { %1129 = vmatprep.subr.bf16.mxu1 %v977_v19  ;;  %v1065_v20 = vpop.permute.xlu0 %1064  ;;  %v922_v38 = vsel %vm2102_vm10, %v911_v58, %v913_v5  ;;  %vm2105_vm8 = vmmov %vm2103_vm6 }
 0x33f   : > { %1130 = vmatpush1.bf16.msra.mxu1 %v976_v18 }
 0x340   : > { %v1063_v24 = vpop.permute.xlu1 %1062  ;;  %1131 = vmatprep.subr.bf16.mxu1 %v975_v21 }
 0x342   : > { %v947_v25 = vpop.permute.xlu0 %946 }
 0x343   : > { %1132 = vmatpush1.bf16.msra.mxu1 %v974_v28 }
 0x344   : > { %v945_v1 = vpop.permute.xlu1 %944 }
 0x345   : > { %v950_v29 = vsel %vm2095_vm9, %v943_v2, %v945_v1  ;;  %v951_v31 = vsel %vm2096_vm11, %v945_v1, %v947_v25  ;;  %vm2106_vm9 = vmmov %vm2104_vm7  ;;  %vm2107_vm11 = vcmask 777216  }
 0x346   : > { %1133 = vmatprep.subr.bf16.mxu1 %v951_v31  ;;  %v1057_v30 = vpop.permute.xlu0 %1056  ;;  %v1069_v42 = vsel %vm2107_vm11, %v1063_v24, %v1065_v20  ;;  %vm2108_vm12 = vmmov %vm2107_vm11 }
 0x347   : > { %1134 = vmatpush1.bf16.msra.mxu1 %v950_v29  ;;  %vm2109_vm14 = vmmov %vm2107_vm11 }
 0x348   : > { %v1061_v34 = vpop.permute.xlu1 %1060  ;;  %1135 = vmatprep.subr.bf16.mxu1 %v949_v33  ;;  %vm2110_vm15 = vmmov %vm2107_vm11 }
 0x34a   : > { %v1055_v36 = vpop.permute.xlu0 %1054 }
 0x34b   : > { %1136 = vmatpush1.bf16.msra.mxu1 %v948_v26  ;;  %v1066_v15 = vsel %vm2110_vm15, %v1055_v36, %v1057_v30 }
 0x34c   : > { %v1059_v44 = vpop.permute.xlu1 %1058  ;;  %1137 = vmatprep.subr.bf16.mxu1 %v925_v39 }
 0x34e   : > { %v1037_v35 = vpop.permute.xlu0 %1036 }
 0x34f   : > { %1138 = vmatpush1.bf16.msra.mxu1 %v924_v32 }
 0x350   : > { %v1041_v47 = vpop.permute.xlu1 %1040  ;;  %1139 = vmatprep.subr.bf16.mxu1 %v923_v37 }
 0x352   : > { %v1035_v40 = vpop.permute.xlu0 %1034 }
 0x353   : > { %1140 = vmatpush1.bf16.msra.mxu1 %v922_v38  ;;  %v1046_v3 = vsel %vm600_vm13, %v1035_v40, %v1037_v35 }
 0x354   : > { %v1039_v51 = vpop.permute.xlu1 %1038  ;;  %1336 = vmatprep.subr.msk.bf16.mxu1 %vm2103_vm6, %v1878_v22  ;;  %v1068_v22 = vsel %vm2108_vm12, %v1061_v34, %v1063_v24 }
 0x355   : > { %v1047_v62 = vsel %vm600_vm13, %v1037_v35, %v1039_v51 }
 0x356   : > { %v1011_v41 = vpop.permute.xlu0 %1010 }
 0x357   : > { %1338 = vmatpush1.bf16.msk.msra.mxu1 %vm2104_vm7, %v1852_v27  ;;  %v1067_v27 = vsel %vm2109_vm14, %v1057_v30, %v1059_v44 }
 0x358   : > { %v1015_v49 = vpop.permute.xlu1 %1014  ;;  %1340 = vmatprep.subr.msk.bf16.mxu1 %vm2105_vm8, %v1847_v23 }
 0x35a   : > { %v1009_v59 = vpop.permute.xlu0 %1008 }
 0x35b   : > { %1342 = vmatpush1.bf16.msk.msra.mxu1 %vm2106_vm9, %v1821_v16  ;;  %v1020_v0 = vsel %vm573_vm5, %v1009_v59, %v1011_v41 }
 0x35c   : > { %v1013_v43 = vpop.permute.xlu1 %1012  ;;  %1145 = vmatprep.subr.bf16.mxu1 %v1069_v42 }
 0x35d   : > { %v1021_v60 = vsel %vm573_vm5, %v1011_v41, %v1013_v43 }
 0x35e   : > { %v993_v45 = vpop.permute.xlu0 %992 }
 0x35f   : > { %1146 = vmatpush2.bf16.msra.mxu1 %v1068_v22 }
 0x360   : > { %v991_v46 = vpop.permute.xlu1 %990  ;;  %1147 = vmatprep.subr.bf16.mxu1 %v1067_v27 }
 0x361   : > { %v997_v63 = vsel %vm546_vm1, %v991_v46, %v993_v45 }
 0x362   : > { %v1045_v23 = vpop.permute.xlu0 %1044 }
 0x363   : > { %1148 = vmatpush2.bf16.msra.mxu1 %v1066_v15 }
 0x364   : > { %v1043_v54 = vpop.permute.xlu1 %1042 }
 0x365   : > { %v1048_v13 = vsel %vm600_vm13, %v1041_v47, %v1043_v54  ;;  %v1049_v16 = vsel %vm600_vm13, %v1043_v54, %v1045_v23 }
 0x366   : > { %1149 = vmatprep.subr.bf16.mxu1 %v1049_v16  ;;  %v1087_v48 = vpop.permute.xlu0 %1086 }
 0x367   : > { %1150 = vmatpush2.bf16.msra.mxu1 %v1048_v13 }
 0x368   : > { %v989_v53 = vpop.permute.xlu1 %988  ;;  %1151 = vmatprep.subr.bf16.mxu1 %v1047_v62 }
 0x369   : > { %v996_v6 = vsel %vm546_vm1, %v989_v53, %v991_v46 }
 0x36a   : > { %v1019_v55 = vpop.permute.xlu0 %1018 }
 0x36b   : > { %1152 = vmatpush2.bf16.msra.mxu1 %v1046_v3 }
 0x36c   : > { %v1017_v56 = vpop.permute.xlu1 %1016 }
 0x36d   : > { %v1022_v7 = vsel %vm573_vm5, %v1015_v49, %v1017_v56  ;;  %v1023_v57 = vsel %vm573_vm5, %v1017_v56, %v1019_v55 }
 0x36e   : > { %1153 = vmatprep.subr.bf16.mxu1 %v1023_v57  ;;  %v987_v58 = vpop.permute.xlu0 %986 }
 0x36f   : > { %1154 = vmatpush2.bf16.msra.mxu1 %v1022_v7 }
 0x370   : > { %v985_v61 = vpop.permute.xlu1 %984  ;;  %1155 = vmatprep.subr.bf16.mxu1 %v1021_v60 }
 0x371   : > { %v995_v9 = vsel %vm546_vm1, %v985_v61, %v987_v58 }
 0x372   : > { %v1089_v4 = vpop.permute.xlu0 %1088 }
 0x373   : > { %1156 = vmatpush2.bf16.msra.mxu1 %v1020_v0  ;;  %v1094_v11 = vsel %vm648_vm2, %v1087_v48, %v1089_v4 }
 0x374   : > { %v983_v5 = vpop.permute.xlu1 %982  ;;  %1157 = vmatprep.subr.bf16.mxu1 %v997_v63 }
 0x375   : > { %v994_v12 = vsel %vm546_vm1, %v983_v5, %v985_v61 }
 0x376   : > { %v1083_v8 = vpop.permute.xlu0 %1082 }
 0x377   : > { %1158 = vmatpush2.bf16.msra.mxu1 %v996_v6 }
 0x378   : > { %v1091_v10 = vpop.permute.xlu1 %1090  ;;  %1159 = vmatprep.subr.bf16.mxu1 %v995_v9 }
 0x379   : > { %v1095_v2 = vsel %vm648_vm2, %v1089_v4, %v1091_v10 }
 0x37a   : > { %1182 = vmatprep.subr.bf16.mxu0 %v1095_v2  ;;  %v1081_v14 = vpop.permute.xlu0 %1080 }
 0x37b   : > { %1160 = vmatpush2.bf16.msra.mxu1 %v994_v12  ;;  %1183 = vmatpush1.bf16.msra.mxu0 %v1094_v11  ;;  %v1092_v19 = vsel %vm648_vm2, %v1081_v14, %v1083_v8 }
 0x37c   : > { %v1085_v17 = vpop.permute.xlu1 %1084 }
 0x37d   : > { %v1093_v18 = vsel %vm648_vm2, %v1083_v8, %v1085_v17 }
 0x37e   : > { %1162 = vmatmul.mubr.bf16.vlgmr.msra.gmra.mxu1 %v1979_v50  ;;  %1184 = vmatprep.subr.bf16.mxu0 %v1093_v18 }
 0x37f   : > { %1185 = vmatpush1.bf16.msra.mxu0 %v1092_v19 }
 0x382   : > { %1343 = vmatmul.mubr.msk.bf16.vlgmr.msra.gmra.mxu0 %vm429_vm3, %v1981_v52 }
 0x389   : > { %v1105_v24 = vpop.permute.xlu1 %1104 }
 0x43e   : > { %v1163_v20 = vpop.f32.mrf.mxu1 }
 0x43f   : > { %v1164_v1 = vadd.f32 %v1163_v20, %v1105_v24 }
 0x440   : > { %v1165_v21 = vpop.f32.mrf.mxu1 }
 0x441   : > { %v1166_v29 = vadd.f32 %v1165_v21, %v1105_v24 }
 0x442   : > { %v1204_v28 = vpop.f32.mrf.mxu0  ;;  %v1167_v25 = vpop.f32.mrf.mxu1 }
 0x443   : > { %v1205_v33 = vadd.f32 %v1204_v28, %v1164_v1 }
 0x444   : > { %v1206_v31 = vpop.f32.mrf.mxu0  ;;  %v1168_v30 = vpop.f32.mrf.mxu1 }
 0x445   : > { %v1207_v34 = vadd.f32 %v1206_v31, %v1166_v29 }
 0x446   : > { %v1208_v50 = vpop.f32.mrf.mxu0 }
 0x447   : > { %v1213_v26 = vcombine.low %v1205_v33, %v1207_v34 }
 0x448   : > { %v1209_v36 = vpop.f32.mrf.mxu0 }
 0x449   : > { %1215 = vst [vmem:[%s259_s15] sm:$0xff] %v1213_v26 }
 0x44a PF: > { %s17_s21 = sadd.s32 1, %s1398_s21  }
 0x44b   : > { %p14_p4 = scmp.ge.s32.totalorder %s17_s21, 4  }
 0x44d   :  { %16 = sbr.rel (!%p14_p4) target bundleno = 1 (0x1), region = 82 }

</bundles_post_ra>
